<compile_context>
chip_gen: v7x
topology: tpu7x:2x2x1
jax: 0.10.0
libtpu: 0.0.40
codegen_flags: <defaults>
</compile_context>

<pallas_src>
import functools

import numpy as np
import jax
import jax.numpy as jnp
from jax.experimental import pallas as pl
from jax.experimental.pallas import tpu as pltpu

LANE = 128


# ------------------------------------------------------------------ projection
def _project_kernel(x_ref, w_ref, o_ref):
    o_ref[...] = jnp.dot(x_ref[...], w_ref[...],
                         preferred_element_type=jnp.float32).astype(o_ref.dtype)


def project(x_bf16, w_bf16, *, tm):
    """XW = X @ W, row-tiled, bf16 output (feeds the propagation kernel)."""
    n, f = x_bf16.shape
    h = w_bf16.shape[1]
    return pl.pallas_call(
        _project_kernel,
        out_shape=jax.ShapeDtypeStruct((n, h), jnp.bfloat16),
        grid=(n // tm,),
        in_specs=[pl.BlockSpec((tm, f), lambda i: (i, 0)),
                  pl.BlockSpec((f, h), lambda i: (0, 0))],
        out_specs=pl.BlockSpec((tm, h), lambda i: (i, 0)),
        compiler_params=pltpu.CompilerParams(dimension_semantics=("parallel",)),
    )(x_bf16, w_bf16)


# ----------------------------------------------------------------- propagation
def _propagate_kernel(cid_ref, cnt_ref, a_ref, xw_ref, b_ref, *rest,
                      fuse_w2, valid_cols):
    if fuse_w2:
        w2_ref, o_ref, acc_ref = rest
    else:
        o_ref, acc_ref = rest

    i = pl.program_id(0)
    k = pl.program_id(1)

    @pl.when(k == 0)
    def _():
        acc_ref[...] = jnp.zeros_like(acc_ref)

    # Skip the matmul for padded (all-zero) adjacency blocks.
    @pl.when(k < cnt_ref[i])
    def _():
        acc_ref[...] += jnp.dot(a_ref[...], xw_ref[...],
                                preferred_element_type=jnp.float32)

    @pl.when(k == pl.num_programs(1) - 1)
    def _():
        h = acc_ref[...] + b_ref[...]
        if fuse_w2:
            # ReLU then the layer-2 projection fused into the epilogue.
            # (Dropout between them is identity in eval mode.)
            h = jnp.maximum(h, 0.0)
            o_ref[...] = jnp.dot(h.astype(jnp.bfloat16), w2_ref[...],
                                 preferred_element_type=jnp.float32
                                 ).astype(o_ref.dtype)
        else:
            # log_softmax over the first `valid_cols` lanes (rest is padding).
            col = jax.lax.broadcasted_iota(jnp.int32, h.shape, 1)
            z = jnp.where(col < valid_cols, h, jnp.float32(-1e30))
            z = z - jnp.max(z, axis=1, keepdims=True)
            lse = jnp.log(jnp.sum(jnp.exp(z), axis=1, keepdims=True))
            o_ref[...] = (z - lse).astype(o_ref.dtype)


def propagate(a_bf16, xw_bf16, bias, col_ids, counts, *, tm, tk, valid_cols,
              out_dtype, w2=None):
    """out = A_hat @ XW + bias, then epilogue (relu @ W2 fusion, or log_softmax)."""
    n = a_bf16.shape[0]
    hp = xw_bf16.shape[1]
    n_row_tiles = n // tm
    max_k = col_ids.shape[1]
    fuse_w2 = w2 is not None
    out_cols = w2.shape[1] if fuse_w2 else hp

    kernel = functools.partial(_propagate_kernel, fuse_w2=fuse_w2,
                               valid_cols=valid_cols)
    in_specs = [
        # A_hat tiles, walking only nonzero col-tiles of row-tile i.
        pl.BlockSpec((tm, tk), lambda i, k, cid, cnt: (i, cid[i, k])),
        # Matching row-block of the projected matrix.
        pl.BlockSpec((tk, hp), lambda i, k, cid, cnt: (cid[i, k], 0)),
        # Bias: full (1, hp) block, DMA'd once (constant index -> dedup).
        pl.BlockSpec((1, hp), lambda i, k, cid, cnt: (0, 0)),
    ]
    operands = [col_ids, counts, a_bf16, xw_bf16, bias]
    if fuse_w2:
        # Small VMEM-resident W2, used only in the epilogue.
        in_specs.append(
            pl.BlockSpec((hp, out_cols), lambda i, k, cid, cnt: (0, 0)))
        operands.append(w2)

    grid_spec = pltpu.PrefetchScalarGridSpec(
        num_scalar_prefetch=2,
        grid=(n_row_tiles, max_k),
        in_specs=in_specs,
        out_specs=pl.BlockSpec((tm, out_cols), lambda i, k, cid, cnt: (i, 0)),
        scratch_shapes=[pltpu.VMEM((tm, hp), jnp.float32)],
    )
    return pl.pallas_call(
        kernel,
        out_shape=jax.ShapeDtypeStruct((n, out_cols), out_dtype),
        grid_spec=grid_spec,
        compiler_params=pltpu.CompilerParams(
            dimension_semantics=("parallel", "arbitrary"),
            vmem_limit_bytes=32 * 1024 * 1024,
        ),
    )(*operands)


# ---------------------------------------------------------- block-sparse setup
def build_block_schedule(a_hat, tm, tk):
    """Compacted nonzero (row-tile -> col-tile) schedule for block-sparse A_hat."""
    n = a_hat.shape[0]
    n_i, n_k = n // tm, n // tk
    blocks = np.asarray(a_hat).reshape(n_i, tm, n_k, tk)
    nz = np.abs(blocks).sum(axis=(1, 3)) > 0.0                 # (n_i, n_k) bool
    counts = nz.sum(axis=1).astype(np.int32)                   # (n_i,)
    max_k = max(int(counts.max()), 1)
    # Stable-sort nonzero col-tiles to the front of each row, keep their indices.
    order = np.argsort(~nz, axis=1, kind="stable")
    all_ids = np.broadcast_to(np.arange(n_k, dtype=np.int32), (n_i, n_k))
    col_ids = np.take_along_axis(all_ids, order, axis=1)[:, :max_k].copy()
    # Padded tail repeats the last valid block index -> DMA dedup, matmul skipped.
    last = col_ids[np.arange(n_i), np.maximum(counts - 1, 0)]
    pad_mask = np.arange(max_k)[None, :] >= counts[:, None]
    col_ids = np.where(pad_mask, last[:, None], col_ids).astype(np.int32)
    return jnp.asarray(col_ids), jnp.asarray(counts)


# ------------------------------------------------------------------- GCN glue
def _pad_cols(w, width):
    out = jnp.zeros((w.shape[0], width), jnp.float32)
    return out.at[:, :w.shape[1]].set(w)


def gcn_forward(a_hat, x, w1, b1, w2, b2, *, tm=128, tk=128):
    n = x.shape[0]
    hid = w1.shape[1]
    n_classes = w2.shape[1]
    assert n % tm == 0 and n % tk == 0

    hp = max(LANE, -(-hid // LANE) * LANE)        # hidden dim padded to 128 lanes
    cp = max(LANE, -(-n_classes // LANE) * LANE)  # class dim padded to 128 lanes

    # Zero-pad params to lane-dense widths (padding rows/cols contribute nothing).
    w1p = _pad_cols(w1, hp).astype(jnp.bfloat16)
    b1p = _pad_cols(b1.reshape(1, -1), hp)
    w2p = (jnp.zeros((hp, cp), jnp.float32)
           .at[:hid, :n_classes].set(w2).astype(jnp.bfloat16))
    b2p = _pad_cols(b2.reshape(1, -1), cp)

    a_bf = a_hat.astype(jnp.bfloat16)             # bf16 A_hat: half the HBM traffic
    col_ids, counts = build_block_schedule(a_hat, tm, tk)

    # layer 1 + fused layer-2 projection:
    #   H1W2 = relu(A_hat @ (X @ W1) + b1) @ W2
    xw1 = project(x.astype(jnp.bfloat16), w1p, tm=tm)
    # F.dropout(x, training=self.training): identity in eval mode.
    # TODO(synk): training-mode dropout (pltpu.prng_* mask) not implemented.
    h1w2 = propagate(a_bf, xw1, b1p, col_ids, counts, tm=tm, tk=tk,
                     valid_cols=hid, out_dtype=jnp.bfloat16, w2=w2p)

    # layer 2 propagation: log_softmax(A_hat @ H1W2 + b2, axis=1)
    logp = propagate(a_bf, h1w2, b2p, col_ids, counts, tm=tm, tk=tk,
                     valid_cols=n_classes, out_dtype=jnp.float32)
    return logp[:, :n_classes]


def build_normalized_adjacency(edge_index, num_nodes):
    """Dense A_hat = D^-1/2 (A + I) D^-1/2 (PyG-style: duplicate edges accumulate)."""
    src, dst = edge_index[0], edge_index[1]
    a = jnp.zeros((num_nodes, num_nodes), jnp.float32)
    a = a.at[dst, src].add(1.0)                       # messages src -> dst
    a = a + jnp.eye(num_nodes, dtype=jnp.float32)     # add self loops
    deg = a.sum(axis=1)
    dinv = jnp.where(deg > 0, deg ** -0.5, 0.0)
    return dinv[:, None] * a * dinv[None, :]


def glorot(key, shape):
    limit = (6.0 / (shape[0] + shape[1])) ** 0.5
    return jax.random.uniform(key, shape, jnp.float32, -limit, limit)


def reference_forward(a_hat, x, w1, b1, w2, b2):
    """Plain-JAX reference with the same bf16-in / f32-accumulate casting."""
    bf = jnp.bfloat16
    a = a_hat.astype(bf)
    xw1 = jnp.dot(x.astype(bf), w1.astype(bf), preferred_element_type=jnp.float32)
    h1 = jnp.maximum(
        jnp.dot(a, xw1.astype(bf), preferred_element_type=jnp.float32) + b1, 0.0)
    hw2 = jnp.dot(h1.astype(bf), w2.astype(bf), preferred_element_type=jnp.float32)
    h2 = jnp.dot(a, hw2.astype(bf), preferred_element_type=jnp.float32) + b2
    return jax.nn.log_softmax(h2, axis=1)


if __name__ == "__main__":
    N, F_IN, HID, C = 512, 32, 16, 8      # nodes, num_features, hidden, num_classes
    E = 2048                               # number of edges

    key = jax.random.PRNGKey(0)
    kx, ke1, ke2, kw1, kw2 = jax.random.split(key, 5)

    # deterministic inputs
    x = jax.random.normal(kx, (N, F_IN), jnp.float32)
    src = jax.random.randint(ke1, (E,), 0, N)
    dst = jax.random.randint(ke2, (E,), 0, N)
    edge_index = jnp.stack([src, dst], axis=0)        # (2, E)

    # deterministic parameters (GCNConv: glorot weight, zero bias)
    w1 = glorot(kw1, (F_IN, HID))
    b1 = jnp.zeros((HID,), jnp.float32)
    w2 = glorot(kw2, (HID, C))
    b2 = jnp.zeros((C,), jnp.float32)

    a_hat = build_normalized_adjacency(edge_index, N)

    out = gcn_forward(a_hat, x, w1, b1, w2, b2, tm=128, tk=128)
    out = jax.block_until_ready(out)

    ref = reference_forward(a_hat, x, w1, b1, w2, b2)
    assert out.shape == (N, C)
    err = jnp.max(jnp.abs(out - ref))
    assert jnp.allclose(out, ref, atol=1e-2, rtol=1e-2), f"max abs err {err}"

    print("KERNEL_OK")
</pallas_src>

<mosaic_0001>
module attributes {stable_mosaic.version = 11 : i64} {
  func.func @_project_kernel(%arg0: i32, %arg1: memref<128x32xbf16, #tpu.memory_space<vmem>>, %arg2: memref<32x128xbf16, #tpu.memory_space<vmem>>, %arg3: memref<128x128xbf16, #tpu.memory_space<vmem>>) attributes {dimension_semantics = [#tpu.dimension_semantics<parallel>], iteration_bounds = array<i64: 4>, scalar_prefetch = 0 : i64, scratch_operands = 0 : i64, tpu.core_type = #tpu.core_type<tc>, window_params = [{transform_indices = @transform_0, window_bounds = array<i64: 128, 32>}, {pipeline_mode = #tpu.pipeline_mode<synchronous>, transform_indices = @transform_1, window_bounds = array<i64: 32, 128>}, {transform_indices = @transform_2, window_bounds = array<i64: 128, 128>}]} {
    %c0 = arith.constant 0 : index
    %c0_0 = arith.constant 0 : index
    %0 = vector.load %arg1[%c0, %c0_0] : memref<128x32xbf16, #tpu.memory_space<vmem>>, vector<128x32xbf16>
    %c0_1 = arith.constant 0 : index
    %c0_2 = arith.constant 0 : index
    %1 = vector.load %arg2[%c0_1, %c0_2] : memref<32x128xbf16, #tpu.memory_space<vmem>>, vector<32x128xbf16>
    %cst = arith.constant dense<0.000000e+00> : vector<128x128xf32>
    %2 = tpu.matmul %0, %1, %cst {dimension_numbers = #tpu.dot_dimension_numbers<[1], [0], [0], [1], [0, 0, 1, 1], [], []>} : vector<128x32xbf16>, vector<32x128xbf16>, vector<128x128xf32> -> vector<128x128xf32>
    %3 = arith.truncf %2 : vector<128x128xf32> to vector<128x128xbf16>
    %c0_3 = arith.constant 0 : index
    %c0_4 = arith.constant 0 : index
    %4 = vector.load %arg3[%c0_3, %c0_4] : memref<128x128xbf16, #tpu.memory_space<vmem>>, vector<128x128xbf16>
    tpu.vector_store %arg3[%c0_3, %c0_4], %3 {strides = array<i32>} : memref<128x128xbf16, #tpu.memory_space<vmem>>, vector<128x128xbf16>,
    return
  }
  func.func @transform_0(%arg0: i32) -> (i32, i32) {
    %c0_i32 = arith.constant 0 : i32
    %c0_i32_0 = arith.constant 0 : i32
    return %arg0, %c0_i32 : i32, i32
  }
  func.func @transform_1(%arg0: i32) -> (i32, i32) {
    %c0_i32 = arith.constant 0 : i32
    %c0_i32_0 = arith.constant 0 : i32
    %c0_i32_1 = arith.constant 0 : i32
    return %c0_i32, %c0_i32_0 : i32, i32
  }
  func.func @transform_2(%arg0: i32) -> (i32, i32) {
    %c0_i32 = arith.constant 0 : i32
    %c0_i32_0 = arith.constant 0 : i32
    return %arg0, %c0_i32 : i32, i32
  }
}

</mosaic_0001>

<bundles_post_ra>
// kernel: tpu_custom_call.1
= control target key start
LH: loop header
LB: loop body
LE: loop exit
PB: predicated region body
PF: predicated region fallthrough
CT: control target
= control target key end

     0   :  { %7 = vsyncpa [#allocation3], 0  ;;  %s893_s0 = inlined_call_operand.vmem [shape: bf16[512,32], index: 0, kind: input, shape index: {}]   ;;  %s894_s1 = inlined_call_operand.vmem [shape: bf16[32,128], index: 1, kind: input, shape index: {}]   ;;  %s895_s2 = inlined_call_operand.hbm [shape: bf16[512,128], index: 2, kind: output, shape index: {}]  }
   0x1   :  { %9 = vsyncpa [#allocation3 + $0x1], 0  ;;  %s773_s9 = smov 0   ;;  %s775_s10 = smov 0  }
   0x2   :  { %s777_s11 = smov 0   ;;  %s779_s12 = smov 0  }
   0x3 LB: > { %s794_s13 = sadd.s32 4294967295, %s753_s12   ;;  %s496_s14 = sadd.s32 4294967294, %s753_s12   ;;  %s753_s12 = sphi %s779_s12, %s901_s12   ;;  %s749_s11 = sphi %s777_s11, %s900_s11   ;;  %s745_s10 = sphi %s775_s10, %s899_s10   ;;  %s741_s9 = sphi %s773_s9, %s898_s9  }
   0x4   : > { %s798_s15 = sadd.s32 1, %s753_s12   ;;  %s69_s16 = sadd.s32 1, %s749_s11 }
   0x5   : > { %s66_s17 = ssub.s32 %s753_s12, %s798_s15  ;;  %p79_p0 = scmp.ne.s32.totalorder %s749_s11, %s745_s10 }
   0x6   : > { %p67_p1 = scmp.eq.s32.totalorder %s66_s17, 0  ;;  %p80_p2 = scmp.eq.s32.totalorder %s794_s13, 3 }
   0x7   : > { %p85_p3 = scmp.ne.s32.totalorder %s745_s10, %s741_s9  ;;  %p86_p4 = scmp.eq.s32.totalorder %s496_s14, 3 }
   0x8   : > { %s809_s18 = scalar_select %p67_p1, %s749_s11, %s69_s16  }
   0x9   : > { %p811_p5 = por %p80_p2, %p79_p0  ;;  %p815_p6 = por %p86_p4, %p85_p3 }
   0xa   : > { %p499_p7 = scmp.ge.s32.totalorder %s753_s12, 1  ;;  %p116_p8 = scmp.lt.s32.totalorder %s753_s12, 5 }
   0xc   : > { %p117_p9 = pnand %p499_p7, %p116_p8 }
   0xd   : > { %v681_v0 = vld [vmem:[%s894_s1] sm:$0xff] (!%p117_p9)   ;;  %s501_s23 = sshll.u32 (!%p117_p9), %s794_s13, 4  ;;  %v682_v1 = vld [vmem:[%s894_s1 + $0x8] sm:$0xff] (!%p117_p9)   ;;  %vm218_vm0 = vcmask (!%p117_p9), 261120   ;;  %s135_s30 = sand.u32 (!%p117_p9), 1, %s745_s10  }
   0xe   : > { %120 = sbr.rel (%p117_p9) target bundleno = 267 (0x10b), region = 28  ;;  %p139_p10 = scmp.lt.s32.totalorder (!%p117_p9), %s501_s23, 63  ;;  %616 = vmatprep.subr.bf16.mxu0 (!%p117_p9), %v681_v0  ;;  %636 = vmatprep.subr.bf16.mxu1 (!%p117_p9), %v681_v0 }
   0xf   : > { %617 = vmatpush3.bf16.msra.mxu0 (!%p117_p9), %v681_v0  ;;  %638 = vmatpush3.bf16.msra.mxu1 (!%p117_p9), %v681_v0  ;;  %s500_s3 = sshll.u32 (!%p117_p9), %s135_s30, 6  ;;  %s558_s5 = sshll.u32 (!%p117_p9), %s794_s13, 10 }
  0x10   : > { %618 = vmatprep.subr.bf16.mxu0 (!%p117_p9), %v682_v1  ;;  %637 = vmatprep.subr.bf16.mxu1 (!%p117_p9), %v682_v1  ;;  %s137_s4 = scalar_lea.vmem (!%p117_p9), [#allocation2], %s500_s3  ;;  %s846_s14 = scalar_lea.hbm (!%p117_p9), %s895_s2, %s558_s5 }
  0x11   : > { %s434_s6 = sshll.u32 (!%p117_p9), %s137_s4, 4  ;;  %s852_s13 = scalar_lea.sflag (!%p117_p9), [#allocation3], %s135_s30  ;;  %s848_s6 = int_to_ptr.vmem [resolvable:$true] %s434_s6 }
  0x12   : > { %s691_s16 = scalar_lea.vmem (!%p117_p9), %s848_s6, 1024  ;;  %s755_s17 = smov (!%p117_p9), [#allocation2]  }
  0x13   : > { %619 = vmatpush3.bf16.msra.mxu0 (!%p117_p9), %v682_v1  ;;  %639 = vmatpush3.bf16.msra.mxu1 (!%p117_p9), %v682_v1  ;;  %p692_p11 = scmp.ne.s32.totalorder (!%p117_p9), %s848_s6, %s691_s16  ;;  %s695_s21 = sshll.u32 (!%p117_p9), %s755_s17, 4  ;;  %s696_s21 = int_to_ptr.vmem [resolvable:$false] %s695_s21 }
  0x14   : > { %s697_s22 = scalar_lea.vmem (!%p117_p9), %s696_s21, 2048  ;;  %p698_p0 = scmp.lt.s32.totalorder (!%p117_p9), %s848_s6, %s696_s21 }
  0x15   : > { %s903_s23 = smov (!%p139_p10, %s501_s23), 63  ;;  %p693_p12 = pnand %p692_p11, %p811_p5 }
  0x16   : > { %s502_s26 = sshll.u32 %s903_s23, 2  ;;  %p699_p1 = scmp.lt.s32.totalorder %s697_s22, %s691_s16 }
  0x17   : > { %s142_s29 = scalar_lea.vmem %s893_s0, %s502_s26  ;;  %p694_p13 = pneg %p693_p12 }
  0x18   : > { %v683_v2 = vld [vmem:[%s142_s29] sm:$0xff]   ;;  %v685_v4 = vld [vmem:[%s142_s29 + $0x8] sm:$0xff]   ;;  %v687_v6 = vld [vmem:[%s142_s29 + $0x10] sm:$0xff]   ;;  %p700_p2 = por %p699_p1, %p698_p0 }
  0x19   : > { %v684_v3 = vld [vmem:[%s142_s29 + $0x20] sm:$0xff]   ;;  %620 = vmatprep.mubr.msk.bf16.mxu0 %vm218_vm0, %v683_v2  ;;  %v686_v5 = vld [vmem:[%s142_s29 + $0x28] sm:$0xff]   ;;  %v688_v7 = vld [vmem:[%s142_s29 + $0x30] sm:$0xff]  }
  0x1a   : > { %628 = vmatprep.mubr.msk.bf16.mxu1 %vm218_vm0, %v684_v3  ;;  %621 = vmatmul.mubr.msk.bf16.vlgmr.msra.gmra.mrb[0].mxu0 %vm218_vm0, %v685_v4  ;;  %v689_v8 = vld [vmem:[%s142_s29 + $0x18] sm:$0xff]   ;;  %p701_p3 = pnand %p700_p2, %p694_p13 }
  0x1b   : > { %629 = vmatmul.mubr.msk.bf16.vlgmr.msra.gmra.mrb[0].mxu1 %vm218_vm0, %v686_v5  ;;  %624 = vmatprep.mubr.msk.bf16.mxu0 %vm218_vm0, %v687_v6  ;;  %v690_v9 = vld [vmem:[%s142_s29 + $0x38] sm:$0xff]  }
  0x1c   : > { %632 = vmatprep.mubr.msk.bf16.mxu1 %vm218_vm0, %v688_v7 }
  0x22   : > { %625 = vmatmul.mubr.msk.bf16.gmra.mrb[4].mxu0 %vm218_vm0, %v689_v8 }
  0x23   : > { %633 = vmatmul.mubr.msk.bf16.gmra.mrb[4].mxu1 %vm218_vm0, %v690_v9 }
  0xed   : > { %v622_v10 = vpop.f32.mrb[0].mxu0 }
  0xee   : > { %v630_v11 = vpop.f32.mrb[0].mxu1  ;;  %v277_v12 = vpop.f32.mrb[1].mxu0 }
  0xef   : > { %v309_v13 = vpop.f32.mrb[1].mxu1  ;;  %v623_v14 = vpop.f32.mrb[2].mxu0 }
  0xf0   : > { %v567_v15 = vpack.c.bf16 %v623_v14, %v622_v10  ;;  %v631_v16 = vpop.f32.mrb[2].mxu1  ;;  %v280_v17 = vpop.f32.mrb[3].mxu0 }
  0xf1   : > { %v587_v18 = vpack.c.bf16 %v631_v16, %v630_v11  ;;  %v562_v19 = vpack.c.bf16 %v280_v17, %v277_v12  ;;  %v312_v20 = vpop.f32.mrb[3].mxu1 }
  0xf2   : > { %599 = vst [vmem:[%s137_s4 + $0x8] sm:$0xff] %v567_v15   ;;  %v582_v21 = vpack.c.bf16 %v312_v20, %v309_v13 }
  0xf3   : > { %603 = vst [vmem:[%s137_s4 + $0x28] sm:$0xff] %v587_v18   ;;  %563 = vst [vmem:[%s137_s4] sm:$0xff] %v562_v19  }
  0xf4   : > { %602 = vst [vmem:[%s137_s4 + $0x20] sm:$0xff] %v582_v21  }
  0xf5   : > { %v626_v22 = vpop.f32.mrb[4].mxu0 }
  0xf6   : > { %v634_v23 = vpop.f32.mrb[4].mxu1  ;;  %v293_v24 = vpop.f32.mrb[5].mxu0 }
  0xf7   : > { %v325_v25 = vpop.f32.mrb[5].mxu1  ;;  %v627_v26 = vpop.f32.mrb[6].mxu0 }
  0xf8   : > { %v577_v27 = vpack.c.bf16 %v627_v26, %v626_v22  ;;  %v635_v28 = vpop.f32.mrb[6].mxu1  ;;  %v296_v29 = vpop.f32.mrb[7].mxu0 }
  0xf9   : > { %v597_v30 = vpack.c.bf16 %v635_v28, %v634_v23  ;;  %v572_v31 = vpack.c.bf16 %v296_v29, %v293_v24  ;;  %v328_v32 = vpop.f32.mrb[7].mxu1 }
  0xfa   : > { %601 = vst [vmem:[%s137_s4 + $0x18] sm:$0xff] %v577_v27   ;;  %v592_v33 = vpack.c.bf16 %v328_v32, %v325_v25 }
  0xfb   : > { %605 = vst [vmem:[%s137_s4 + $0x38] sm:$0xff] %v597_v30   ;;  %600 = vst [vmem:[%s137_s4 + $0x10] sm:$0xff] %v572_v31  }
  0xfc   : > { %604 = vst [vmem:[%s137_s4 + $0x30] sm:$0xff] %v592_v33  }
  0xfd   : > { %704 = shalt.err (!%p701_p3)
}
  0xfe   : > { %s705_s23 = scalar_lea.hbm %s846_s14, 1024  ;;  %s709_s26 = scalar_lea.hbm %s895_s2, 4096 }
  0xff   : > { %p706_p4 = scmp.ne.s32.totalorder %s846_s14, %s705_s23  ;;  %p710_p9 = scmp.lt.u32.totalorder %s846_s14, %s895_s2 }
 0x100   : > { %p711_p10 = scmp.lt.u32.totalorder %s709_s26, %s705_s23  ;;  %p713_p12 = scmp.lt.u32.totalorder %s705_s23, %s846_s14 }
 0x101   : > { %p707_p7 = pnand %p706_p4, %p811_p5 }
 0x102   : > { %p712_p11 = por %p711_p10, %p710_p9 }
 0x103   : > { %p708_p8 = pneg %p707_p7 }
 0x104   : > { %p714_p13 = por %p713_p12, %p712_p11 }
 0x106   : > { %p715_p0 = pnand %p714_p13, %p708_p8 }
 0x108   : > { %718 = shalt.err (!%p715_p0)
}
 0x109   : > { %s756_s29 = smov 64   ;;  %s757_s30 = smov 4  }
 0x10a   : > { %640 = dma.vmem_to_hbm [thread:$0]  (%p811_p5), %s848_s6, 1024, %s846_s14, %s852_s13, %s756_s29, %s756_s29, %s757_s30  }
 0x10b PF: > { %p646_p1 = scmp.ge.s32.totalorder %s753_s12, 2  ;;  %s449_s3 = sand.u32 1, %s741_s9  }
 0x10c   : > { %s450_s4 = scalar_lea.sflag [#allocation3], %s449_s3 }
 0x10d   : > { %p643_p2 = pnand %p646_p1, %p815_p6 }
 0x10f   : > { %736 = dma.done.wait (!%p643_p2), %s450_s4, 1024  }
 0x110   : > { %738 = vsyncadd (!%p643_p2), %s450_s4, 4294966272  ;;  %p12_p3 = scmp.ge.s32.totalorder %s798_s15, 6   ;;  %s898_s9 = smov %s745_s10 }
 0x111   : > { %s899_s10 = smov %s749_s11  ;;  %s900_s11 = smov %s809_s18 }
 0x112   : > { %s901_s12 = smov %s798_s15  ;;  %14 = sbr.rel (!%p12_p3) target bundleno = 3 (0x3), region = 63 }
 0x119   :  { %455 = vsyncpa [#allocation3], 1 }
 0x11a   :  { %457 = vsyncpa [#allocation3 + $0x1], 1 }

</bundles_post_ra>
